<compile_context>
chip_gen: v7x
topology: tpu7x:2x2x1
jax: 0.10.0
libtpu: 0.0.40
codegen_flags: <defaults>
</compile_context>

<pallas_src>
import math

import jax
import jax.numpy as jnp
from jax import lax
from jax.experimental import pallas as pl
from jax.experimental.pallas import tpu as pltpu

LRELU_SLOPE = 0.1
BN_EPS = 1e-5
SPP_KERNELS = (5, 9, 13)
ACT_DTYPE = jnp.bfloat16      # activation / weight dtype on the wire
MAX_COUT_TILE = 256           # weight tile (9*1024, 256) bf16 ~ 4.5 MiB -> fits v7x


# --------------------------------------------------------------------------
# Pallas kernels
# --------------------------------------------------------------------------
def _make_conv_kernel(tap_offsets, cin, m_out, has_residual):
    """Fused direct-conv kernel: per static tap offset, slice m_out rows of the
    flattened padded image and accumulate (m_out, cin) @ (cin, tn) on the MXU
    in f32; then folded-BN bias + LeakyReLU(0.1) (+ optional residual add)."""

    def kernel(x_ref, w_ref, b_ref, *refs):
        if has_residual:
            r_ref, o_ref = refs
        else:
            (o_ref,) = refs
        acc = None
        for t, off in enumerate(tap_offsets):
            xt = x_ref[0, pl.ds(off, m_out), :]        # (m_out, cin) bf16
            wt = w_ref[pl.ds(t * cin, cin), :]         # (cin, tn)    bf16
            d = jnp.dot(xt, wt, preferred_element_type=jnp.float32)
            acc = d if acc is None else acc + d
        y = acc + b_ref[...]                           # folded BN bias (f32)
        y = jnp.where(y > 0, y, LRELU_SLOPE * y)       # LeakyReLU(0.1)
        if has_residual:
            y = y + r_ref[0].astype(jnp.float32)
        o_ref[0] = y.astype(o_ref.dtype)

    return kernel


def _fused_conv_pallas(x, w, bias, tap_offsets, cin_per_tap, m_out, residual=None):
    """out[n, r, :] = lrelu(sum_t x[n, r+off_t, :] @ w_t + bias) [+ residual]."""
    N, m_in, cin_total = x.shape
    K, cout = w.shape
    tn = cout if cout <= MAX_COUT_TILE else MAX_COUT_TILE
    assert cout % tn == 0
    grid = (N, cout // tn)
    bias2 = bias.reshape(1, cout).astype(jnp.float32)

    kernel = _make_conv_kernel(tuple(tap_offsets), cin_per_tap, m_out,
                               residual is not None)

    in_specs = [
        # whole flattened image; index constant in j -> DMA'd once per image
        pl.BlockSpec((1, m_in, cin_total), lambda n, j: (n, 0, 0)),
        pl.BlockSpec((K, tn), lambda n, j: (0, j)),    # Cout-tiled weights
        pl.BlockSpec((1, tn), lambda n, j: (0, j)),    # folded BN bias
    ]
    args = [x, w, bias2]
    if residual is not None:
        in_specs.append(pl.BlockSpec((1, m_out, tn), lambda n, j: (n, 0, j)))
        args.append(residual)

    return pl.pallas_call(
        kernel,
        out_shape=jax.ShapeDtypeStruct((N, m_out, cout), ACT_DTYPE),
        grid=grid,
        in_specs=in_specs,
        out_specs=pl.BlockSpec((1, m_out, tn), lambda n, j: (n, 0, j)),
        compiler_params=pltpu.CompilerParams(
            dimension_semantics=("parallel", "parallel")),
    )(*args)


def _maxpool_same_pallas(x, k):
    """MaxPool2d(kernel=k, stride=1, padding=k//2) on NHWC via separable max,
    tiled over (N, C)."""
    p = k // 2
    xp = jnp.pad(x, ((0, 0), (p, p), (p, p), (0, 0)), constant_values=-jnp.inf)
    N, Hp, Wp, C = xp.shape
    H, W = x.shape[1], x.shape[2]
    tc = C if C <= 128 else 128
    assert C % tc == 0

    def kernel(xp_ref, o_ref):
        v = xp_ref[0]                                  # (Hp, Wp, tc)
        r = v[0:H]
        for dy in range(1, k):                         # max over window rows
            r = jnp.maximum(r, v[dy:dy + H])
        o = r[:, 0:W, :]
        for dx in range(1, k):                         # max over window cols
            o = jnp.maximum(o, r[:, dx:dx + W, :])
        o_ref[0] = o

    return pl.pallas_call(
        kernel,
        out_shape=jax.ShapeDtypeStruct((N, H, W, C), x.dtype),
        grid=(N, C // tc),
        in_specs=[pl.BlockSpec((1, Hp, Wp, tc), lambda n, j: (n, 0, 0, j))],
        out_specs=pl.BlockSpec((1, H, W, tc), lambda n, j: (n, 0, 0, j)),
        compiler_params=pltpu.CompilerParams(
            dimension_semantics=("parallel", "parallel")),
    )(xp)


# --------------------------------------------------------------------------
# JAX glue: conv application, parameter construction, module structure
# --------------------------------------------------------------------------
def _im2col(x, k, stride):
    """x: (N,H,W,C) -> patches (N, Ho*Wo, k*k*C), zero padding (k-1)//2."""
    p = (k - 1) // 2
    xp = jnp.pad(x, ((0, 0), (p, p), (p, p), (0, 0)))
    N, Hp, Wp, C = xp.shape
    Ho = (Hp - k) // stride + 1
    Wo = (Wp - k) // stride + 1
    cols = [xp[:, dy:dy + stride * Ho:stride, dx:dx + stride * Wo:stride, :]
            for dy in range(k) for dx in range(k)]
    patches = jnp.concatenate(cols, axis=-1) if len(cols) > 1 else cols[0]
    return patches.reshape(N, Ho * Wo, k * k * C), (Ho, Wo)


def _apply_base_conv(x, p, residual=None):
    """BaseConv = Conv2d(bias=False) + BatchNorm2d + LeakyReLU(0.1) (+ residual)."""
    k, s = p["k"], p["stride"]
    w, bias = p["w"], p["bias"]
    cout = w.shape[1]
    N, H, W, C = x.shape

    if s == 1 and k == 1:
        # 1x1 conv: plain matmul over the flattened spatial dim (no padding).
        m = H * W
        res = None if residual is None else residual.reshape(N, m, cout)
        out = _fused_conv_pallas(x.reshape(N, m, C), w, bias, (0,), C, m, res)
        return out.reshape(N, H, W, cout)

    if s == 1:
        # k x k stride-1 conv fused in-kernel via row-shifted matmuls over the
        # flattened padded image.  The kernel computes Wp columns per output
        # row (the last k-1 of each row are junk straddling row boundaries);
        # the wrapper slices them off afterwards.
        pad = (k - 1) // 2
        Hp, Wp = H + 2 * pad, W + 2 * pad
        # one extra zero row at the bottom keeps the largest tap offset in
        # bounds for the junk columns of the last output row.
        xp = jnp.pad(x, ((0, 0), (pad, pad + 1), (pad, pad), (0, 0)))
        x_flat = xp.reshape(N, (Hp + 1) * Wp, C)
        m_out = H * Wp
        taps = tuple(dy * Wp + dx for dy in range(k) for dx in range(k))
        res = None
        if residual is not None:
            rp = jnp.pad(residual, ((0, 0), (0, 0), (0, Wp - W), (0, 0)))
            res = rp.reshape(N, m_out, cout)
        out = _fused_conv_pallas(x_flat, w, bias, taps, C, m_out, res)
        return out.reshape(N, H, Wp, cout)[:, :, :W, :]

    # Stride-2 downsample convs (6 layers total): light im2col fallback.
    # TODO(synk): fuse strided taps in-kernel (pl.ds(..., stride=s)) too.
    patches, (Ho, Wo) = _im2col(x, k, s)
    m_out = Ho * Wo
    res = None if residual is None else residual.reshape(N, m_out, cout)
    out = _fused_conv_pallas(patches, w, bias, (0,), patches.shape[-1], m_out, res)
    return out.reshape(N, Ho, Wo, cout)


def _init_base_conv(key, cin, cout, k, stride):
    """BaseConv = Conv2d(bias=False) + BatchNorm2d + LeakyReLU(0.1); BN folded."""
    kw, kg, kb, km, kv = jax.random.split(key, 5)
    fan_in = cin * k * k
    w = jax.random.normal(kw, (cout, cin, k, k), jnp.float32) / math.sqrt(fan_in)
    gamma = 1.0 + 0.1 * jax.random.normal(kg, (cout,), jnp.float32)
    beta = 0.1 * jax.random.normal(kb, (cout,), jnp.float32)
    mean = 0.1 * jax.random.normal(km, (cout,), jnp.float32)
    var = 1.0 + 0.5 * jax.random.uniform(kv, (cout,), jnp.float32)
    scale = gamma / jnp.sqrt(var + BN_EPS)
    bias = beta - mean * scale
    # (Cout,Cin,kh,kw) -> (kh,kw,Cin,Cout) -> (k*k*Cin, Cout), tap-major order.
    # Fold the BN scale into the weights in f32, then cast to bf16 (MXU path).
    w_mat = jnp.transpose(w, (2, 3, 1, 0)).reshape(k * k * cin, cout)
    w_mat = (w_mat * scale[None, :]).astype(ACT_DTYPE)
    return {"w": w_mat, "bias": bias, "k": k, "stride": stride}


def _init_residual(key, channels):
    k1, k2 = jax.random.split(key)
    mid = channels // 2
    return {"conv1": _init_base_conv(k1, channels, mid, 1, 1),
            "conv2": _init_base_conv(k2, mid, channels, 3, 1)}


def _apply_residual(x, p):
    y = _apply_base_conv(x, p["conv1"])
    return _apply_base_conv(y, p["conv2"], residual=x)   # x + lrelu(bn(conv(..)))


def _init_spp(key, cin, cout):
    k1, k2 = jax.random.split(key)
    hidden = cin // 2
    return {"conv1": _init_base_conv(k1, cin, hidden, 1, 1),
            "conv2": _init_base_conv(k2, hidden * (len(SPP_KERNELS) + 1), cout, 1, 1)}


def _apply_spp(x, p):
    y = _apply_base_conv(x, p["conv1"])
    # Cascaded pools: 5∘5 = 9, 9∘5 = 13 (stride-1 same-pad max pools compose),
    # ~1.8x fewer VPU max ops than independent 5/9/13 windows.
    p5 = _maxpool_same_pallas(y, 5)
    p9 = _maxpool_same_pallas(p5, 5)
    p13 = _maxpool_same_pallas(p9, 5)
    cat = jnp.concatenate([y, p5, p9, p13], axis=-1)
    return _apply_base_conv(cat, p["conv2"])


def _group_block(key, cin, num_blocks, stride):
    keys = jax.random.split(key, num_blocks + 1)
    ops = [("conv", _init_base_conv(keys[0], cin, cin * 2, 3, stride))]
    for i in range(num_blocks):
        ops.append(("res", _init_residual(keys[i + 1], cin * 2)))
    return ops


def _spp_block(key, cin, cout, hidden):
    keys = jax.random.split(key, 5)
    return [
        ("conv", _init_base_conv(keys[0], cin, cout, 1, 1)),
        ("conv", _init_base_conv(keys[1], cout, hidden, 3, 1)),
        ("spp", _init_spp(keys[2], hidden, cout)),
        ("conv", _init_base_conv(keys[3], cout, hidden, 3, 1)),
        ("conv", _init_base_conv(keys[4], hidden, cout, 1, 1)),
    ]


def build_darknet53(key, in_channels, stem_out_channels=32,
                    output=("c3", "c4", "c5")):
    num_blocks = [2, 8, 8, 4]
    keys = jax.random.split(key, 8)
    stages = {}
    stages["c1"] = ([("conv", _init_base_conv(keys[0], in_channels,
                                              stem_out_channels, 3, 1))]
                    + _group_block(keys[1], stem_out_channels, 1, 2))
    c = stem_out_channels * 2
    stages["c2"] = _group_block(keys[2], c, num_blocks[0], 2)
    c *= 2
    stages["c3"] = _group_block(keys[3], c, num_blocks[1], 2)
    c *= 2
    stages["c4"] = _group_block(keys[4], c, num_blocks[2], 2)
    c *= 2
    stages["c5"] = (_group_block(keys[5], c, num_blocks[3], 2)
                    + _spp_block(keys[6], c * 2, c, c * 2))
    return {"stages": stages, "output": tuple(output)}


_APPLY = {"conv": lambda x, p: _apply_base_conv(x, p),
          "res": _apply_residual,
          "spp": _apply_spp}


def darknet53_forward(params, x_nchw):
    # layout: NCHW f32 input -> NHWC bf16 for the kernels, outputs back NCHW f32.
    x = jnp.transpose(x_nchw, (0, 2, 3, 1)).astype(ACT_DTYPE)
    outputs = {}
    for name in ("c1", "c2", "c3", "c4", "c5"):
        for op_type, p in params["stages"][name]:
            x = _APPLY[op_type](x, p)
        outputs[name] = x
    return {k: jnp.transpose(v, (0, 3, 1, 2)).astype(jnp.float32)
            for k, v in outputs.items() if k in params["output"]}


# --------------------------------------------------------------------------
# Self-checks against XLA references (small shapes, loose bf16 tolerance)
# --------------------------------------------------------------------------
def _check_conv_against_xla(key):
    kx, kp = jax.random.split(key)
    x = jax.random.normal(kx, (2, 8, 8, 16), jnp.float32).astype(ACT_DTYPE)
    for stride in (1, 2):
        p = _init_base_conv(kp, 16, 32, 3, stride)
        got = _apply_base_conv(x, p).astype(jnp.float32)
        w_hwio = p["w"].astype(jnp.float32).reshape(3, 3, 16, 32)
        ref = lax.conv_general_dilated(
            x.astype(jnp.float32), w_hwio, (stride, stride),
            [(1, 1), (1, 1)], dimension_numbers=("NHWC", "HWIO", "NHWC"),
            precision=lax.Precision.HIGHEST)
        ref = ref + p["bias"][None, None, None, :]
        ref = jnp.where(ref > 0, ref, LRELU_SLOPE * ref)
        assert got.shape == ref.shape
        err = float(jnp.max(jnp.abs(got - ref)))
        assert err < 0.08, (stride, err)


def _check_pool_against_xla(key):
    x = jax.random.normal(key, (2, 4, 4, 128), jnp.float32).astype(ACT_DTYPE)
    got = _maxpool_same_pallas(x, 5).astype(jnp.float32)
    ref = lax.reduce_window(x.astype(jnp.float32), -jnp.inf, lax.max,
                            (1, 5, 5, 1), (1, 1, 1, 1),
                            [(0, 0), (2, 2), (2, 2), (0, 0)])
    assert bool(jnp.all(got == ref))


if __name__ == "__main__":
    key = jax.random.PRNGKey(0)
    pkey, xkey, ckey = jax.random.split(key, 3)

    # Unit checks of the fused conv kernel (both paths) and the pool kernel.
    _check_conv_against_xla(ckey)
    _check_pool_against_xla(ckey)

    # Small config: batch=2, in_channels=4, stem=8.  Spatial 64 so that after
    # the five stride-2 downsamples the c5 feature map is 2x2.
    N, Cin, H, W = 2, 4, 64, 64
    params = build_darknet53(pkey, in_channels=Cin, stem_out_channels=8,
                             output=("c3", "c4", "c5"))
    x = jax.random.normal(xkey, (N, Cin, H, W), jnp.float32)

    fwd = jax.jit(lambda inp: darknet53_forward(params, inp))
    outs = jax.block_until_ready(fwd(x))

    assert outs["c3"].shape == (N, 64, 8, 8)
    assert outs["c4"].shape == (N, 128, 4, 4)
    assert outs["c5"].shape == (N, 128, 2, 2)
    for name in ("c3", "c4", "c5"):
        assert bool(jnp.isfinite(outs[name]).all())
    print("KERNEL_OK")
</pallas_src>

<mosaic_0001>
module attributes {stable_mosaic.version = 11 : i64} {
  func.func @kernel(%arg0: i32, %arg1: i32, %arg2: memref<1x110x16xbf16, #tpu.memory_space<vmem>>, %arg3: memref<144x32xbf16, #tpu.memory_space<vmem>>, %arg4: memref<1x32xf32, #tpu.memory_space<vmem>>, %arg5: memref<1x80x32xbf16, #tpu.memory_space<vmem>>) attributes {dimension_semantics = [#tpu.dimension_semantics<parallel>, #tpu.dimension_semantics<parallel>], iteration_bounds = array<i64: 2, 1>, scalar_prefetch = 0 : i64, scratch_operands = 0 : i64, tpu.core_type = #tpu.core_type<tc>, window_params = [{transform_indices = @transform_0, window_bounds = array<i64: 1, 110, 16>}, {transform_indices = @transform_1, window_bounds = array<i64: 144, 32>}, {transform_indices = @transform_2, window_bounds = array<i64: 1, 32>}, {transform_indices = @transform_3, window_bounds = array<i64: 1, 80, 32>}]} {
    %c0 = arith.constant 0 : index
    %c0_0 = arith.constant 0 : index
    %c0_1 = arith.constant 0 : index
    %0 = vector.load %arg2[%c0, %c0_0, %c0_1] : memref<1x110x16xbf16, #tpu.memory_space<vmem>>, vector<1x80x16xbf16>
    %1 = vector.shape_cast %0 : vector<1x80x16xbf16> to vector<80x16xbf16>
    %c0_2 = arith.constant 0 : index
    %c0_3 = arith.constant 0 : index
    %2 = vector.load %arg3[%c0_2, %c0_3] : memref<144x32xbf16, #tpu.memory_space<vmem>>, vector<16x32xbf16>
    %cst = arith.constant dense<0.000000e+00> : vector<80x32xf32>
    %3 = tpu.matmul %1, %2, %cst {dimension_numbers = #tpu.dot_dimension_numbers<[1], [0], [0], [1], [0, 0, 1, 1], [], []>} : vector<80x16xbf16>, vector<16x32xbf16>, vector<80x32xf32> -> vector<80x32xf32>
    %c0_4 = arith.constant 0 : index
    %c1 = arith.constant 1 : index
    %c0_5 = arith.constant 0 : index
    %4 = vector.load %arg2[%c0_4, %c1, %c0_5] : memref<1x110x16xbf16, #tpu.memory_space<vmem>>, vector<1x80x16xbf16>
    %5 = vector.shape_cast %4 : vector<1x80x16xbf16> to vector<80x16xbf16>
    %c16 = arith.constant 16 : index
    %c0_6 = arith.constant 0 : index
    %6 = vector.load %arg3[%c16, %c0_6] : memref<144x32xbf16, #tpu.memory_space<vmem>>, vector<16x32xbf16>
    %cst_7 = arith.constant dense<0.000000e+00> : vector<80x32xf32>
    %7 = tpu.matmul %5, %6, %cst_7 {dimension_numbers = #tpu.dot_dimension_numbers<[1], [0], [0], [1], [0, 0, 1, 1], [], []>} : vector<80x16xbf16>, vector<16x32xbf16>, vector<80x32xf32> -> vector<80x32xf32>
    %8 = arith.addf %3, %7 : vector<80x32xf32>
    %c0_8 = arith.constant 0 : index
    %c2 = arith.constant 2 : index
    %c0_9 = arith.constant 0 : index
    %9 = vector.load %arg2[%c0_8, %c2, %c0_9] : memref<1x110x16xbf16, #tpu.memory_space<vmem>>, vector<1x80x16xbf16>
    %10 = vector.shape_cast %9 : vector<1x80x16xbf16> to vector<80x16xbf16>
    %c32 = arith.constant 32 : index
    %c0_10 = arith.constant 0 : index
    %11 = vector.load %arg3[%c32, %c0_10] : memref<144x32xbf16, #tpu.memory_space<vmem>>, vector<16x32xbf16>
    %cst_11 = arith.constant dense<0.000000e+00> : vector<80x32xf32>
    %12 = tpu.matmul %10, %11, %cst_11 {dimension_numbers = #tpu.dot_dimension_numbers<[1], [0], [0], [1], [0, 0, 1, 1], [], []>} : vector<80x16xbf16>, vector<16x32xbf16>, vector<80x32xf32> -> vector<80x32xf32>
    %13 = arith.addf %8, %12 : vector<80x32xf32>
    %c0_12 = arith.constant 0 : index
    %c10 = arith.constant 10 : index
    %c0_13 = arith.constant 0 : index
    %14 = vector.load %arg2[%c0_12, %c10, %c0_13] : memref<1x110x16xbf16, #tpu.memory_space<vmem>>, vector<1x80x16xbf16>
    %15 = vector.shape_cast %14 : vector<1x80x16xbf16> to vector<80x16xbf16>
    %c48 = arith.constant 48 : index
    %c0_14 = arith.constant 0 : index
    %16 = vector.load %arg3[%c48, %c0_14] : memref<144x32xbf16, #tpu.memory_space<vmem>>, vector<16x32xbf16>
    %cst_15 = arith.constant dense<0.000000e+00> : vector<80x32xf32>
    %17 = tpu.matmul %15, %16, %cst_15 {dimension_numbers = #tpu.dot_dimension_numbers<[1], [0], [0], [1], [0, 0, 1, 1], [], []>} : vector<80x16xbf16>, vector<16x32xbf16>, vector<80x32xf32> -> vector<80x32xf32>
    %18 = arith.addf %13, %17 : vector<80x32xf32>
    %c0_16 = arith.constant 0 : index
    %c11 = arith.constant 11 : index
    %c0_17 = arith.constant 0 : index
    %19 = vector.load %arg2[%c0_16, %c11, %c0_17] : memref<1x110x16xbf16, #tpu.memory_space<vmem>>, vector<1x80x16xbf16>
    %20 = vector.shape_cast %19 : vector<1x80x16xbf16> to vector<80x16xbf16>
    %c64 = arith.constant 64 : index
    %c0_18 = arith.constant 0 : index
    %21 = vector.load %arg3[%c64, %c0_18] : memref<144x32xbf16, #tpu.memory_space<vmem>>, vector<16x32xbf16>
    %cst_19 = arith.constant dense<0.000000e+00> : vector<80x32xf32>
    %22 = tpu.matmul %20, %21, %cst_19 {dimension_numbers = #tpu.dot_dimension_numbers<[1], [0], [0], [1], [0, 0, 1, 1], [], []>} : vector<80x16xbf16>, vector<16x32xbf16>, vector<80x32xf32> -> vector<80x32xf32>
    %23 = arith.addf %18, %22 : vector<80x32xf32>
    %c0_20 = arith.constant 0 : index
    %c12 = arith.constant 12 : index
    %c0_21 = arith.constant 0 : index
    %24 = vector.load %arg2[%c0_20, %c12, %c0_21] : memref<1x110x16xbf16, #tpu.memory_space<vmem>>, vector<1x80x16xbf16>
    %25 = vector.shape_cast %24 : vector<1x80x16xbf16> to vector<80x16xbf16>
    %c80 = arith.constant 80 : index
    %c0_22 = arith.constant 0 : index
    %26 = vector.load %arg3[%c80, %c0_22] : memref<144x32xbf16, #tpu.memory_space<vmem>>, vector<16x32xbf16>
    %cst_23 = arith.constant dense<0.000000e+00> : vector<80x32xf32>
    %27 = tpu.matmul %25, %26, %cst_23 {dimension_numbers = #tpu.dot_dimension_numbers<[1], [0], [0], [1], [0, 0, 1, 1], [], []>} : vector<80x16xbf16>, vector<16x32xbf16>, vector<80x32xf32> -> vector<80x32xf32>
    %28 = arith.addf %23, %27 : vector<80x32xf32>
    %c0_24 = arith.constant 0 : index
    %c20 = arith.constant 20 : index
    %c0_25 = arith.constant 0 : index
    %29 = vector.load %arg2[%c0_24, %c20, %c0_25] : memref<1x110x16xbf16, #tpu.memory_space<vmem>>, vector<1x80x16xbf16>
    %30 = vector.shape_cast %29 : vector<1x80x16xbf16> to vector<80x16xbf16>
    %c96 = arith.constant 96 : index
    %c0_26 = arith.constant 0 : index
    %31 = vector.load %arg3[%c96, %c0_26] : memref<144x32xbf16, #tpu.memory_space<vmem>>, vector<16x32xbf16>
    %cst_27 = arith.constant dense<0.000000e+00> : vector<80x32xf32>
    %32 = tpu.matmul %30, %31, %cst_27 {dimension_numbers = #tpu.dot_dimension_numbers<[1], [0], [0], [1], [0, 0, 1, 1], [], []>} : vector<80x16xbf16>, vector<16x32xbf16>, vector<80x32xf32> -> vector<80x32xf32>
    %33 = arith.addf %28, %32 : vector<80x32xf32>
    %c0_28 = arith.constant 0 : index
    %c21 = arith.constant 21 : index
    %c0_29 = arith.constant 0 : index
    %34 = vector.load %arg2[%c0_28, %c21, %c0_29] : memref<1x110x16xbf16, #tpu.memory_space<vmem>>, vector<1x80x16xbf16>
    %35 = vector.shape_cast %34 : vector<1x80x16xbf16> to vector<80x16xbf16>
    %c112 = arith.constant 112 : index
    %c0_30 = arith.constant 0 : index
    %36 = vector.load %arg3[%c112, %c0_30] : memref<144x32xbf16, #tpu.memory_space<vmem>>, vector<16x32xbf16>
    %cst_31 = arith.constant dense<0.000000e+00> : vector<80x32xf32>
    %37 = tpu.matmul %35, %36, %cst_31 {dimension_numbers = #tpu.dot_dimension_numbers<[1], [0], [0], [1], [0, 0, 1, 1], [], []>} : vector<80x16xbf16>, vector<16x32xbf16>, vector<80x32xf32> -> vector<80x32xf32>
    %38 = arith.addf %33, %37 : vector<80x32xf32>
    %c0_32 = arith.constant 0 : index
    %c22 = arith.constant 22 : index
    %c0_33 = arith.constant 0 : index
    %39 = vector.load %arg2[%c0_32, %c22, %c0_33] : memref<1x110x16xbf16, #tpu.memory_space<vmem>>, vector<1x80x16xbf16>
    %40 = vector.shape_cast %39 : vector<1x80x16xbf16> to vector<80x16xbf16>
    %c128 = arith.constant 128 : index
    %c0_34 = arith.constant 0 : index
    %41 = vector.load %arg3[%c128, %c0_34] : memref<144x32xbf16, #tpu.memory_space<vmem>>, vector<16x32xbf16>
    %cst_35 = arith.constant dense<0.000000e+00> : vector<80x32xf32>
    %42 = tpu.matmul %40, %41, %cst_35 {dimension_numbers = #tpu.dot_dimension_numbers<[1], [0], [0], [1], [0, 0, 1, 1], [], []>} : vector<80x16xbf16>, vector<16x32xbf16>, vector<80x32xf32> -> vector<80x32xf32>
    %43 = arith.addf %38, %42 : vector<80x32xf32>
    %c0_36 = arith.constant 0 : index
    %c0_37 = arith.constant 0 : index
    %44 = vector.load %arg4[%c0_36, %c0_37] : memref<1x32xf32, #tpu.memory_space<vmem>>, vector<1x32xf32>
    %45 = vector.broadcast %44 : vector<1x32xf32> to vector<80x32xf32>
    %46 = arith.addf %43, %45 : vector<80x32xf32>
    %cst_38 = arith.constant 0.000000e+00 : f32
    %47 = vector.broadcast %cst_38 : f32 to vector<80x32xf32>
    %48 = arith.cmpf ogt, %46, %47 : vector<80x32xf32>
    %cst_39 = arith.constant 1.000000e-01 : f32
    %49 = vector.broadcast %cst_39 : f32 to vector<80x32xf32>
    %50 = arith.mulf %49, %46 : vector<80x32xf32>
    %51 = arith.select %48, %46, %50 : vector<80x32xi1>, vector<80x32xf32>
    %52 = arith.truncf %51 : vector<80x32xf32> to vector<80x32xbf16>
    %c0_40 = arith.constant 0 : index
    %c0_41 = arith.constant 0 : index
    %c0_42 = arith.constant 0 : index
    %53 = vector.load %arg5[%c0_40, %c0_41, %c0_42] : memref<1x80x32xbf16, #tpu.memory_space<vmem>>, vector<1x80x32xbf16>
    %54 = vector.shape_cast %53 : vector<1x80x32xbf16> to vector<80x32xbf16>
    %55 = vector.shape_cast %52 : vector<80x32xbf16> to vector<1x80x32xbf16>
    tpu.vector_store %arg5[%c0_40, %c0_41, %c0_42], %55 {strides = array<i32>} : memref<1x80x32xbf16, #tpu.memory_space<vmem>>, vector<1x80x32xbf16>,
    return
  }
  func.func @transform_0(%arg0: i32, %arg1: i32) -> (i32, i32, i32) {
    %c0_i32 = arith.constant 0 : i32
    %c0_i32_0 = arith.constant 0 : i32
    %c0_i32_1 = arith.constant 0 : i32
    return %arg0, %c0_i32, %c0_i32_0 : i32, i32, i32
  }
  func.func @transform_1(%arg0: i32, %arg1: i32) -> (i32, i32) {
    %c0_i32 = arith.constant 0 : i32
    %c0_i32_0 = arith.constant 0 : i32
    return %c0_i32, %arg1 : i32, i32
  }
  func.func @transform_2(%arg0: i32, %arg1: i32) -> (i32, i32) {
    %c0_i32 = arith.constant 0 : i32
    %c0_i32_0 = arith.constant 0 : i32
    return %c0_i32, %arg1 : i32, i32
  }
  func.func @transform_3(%arg0: i32, %arg1: i32) -> (i32, i32, i32) {
    %c0_i32 = arith.constant 0 : i32
    %c0_i32_0 = arith.constant 0 : i32
    return %arg0, %c0_i32, %arg1 : i32, i32, i32
  }
}

</mosaic_0001>

<bundles_post_ra>
// kernel: tpu_custom_call.1
= control target key start
LH: loop header
LB: loop body
LE: loop exit
PB: predicated region body
PF: predicated region fallthrough
CT: control target
= control target key end

     0   :  { %s2173_s12 = smov 0   ;;  %s2175_s13 = smov 0   ;;  %s2601_s0 = inlined_call_operand.vmem [shape: bf16[2,110,16], index: 0, kind: input, shape index: {}]   ;;  %s2602_s1 = inlined_call_operand.vmem [shape: bf16[144,32], index: 1, kind: input, shape index: {}]   ;;  %s2603_s2 = inlined_call_operand.vmem [shape: f32[1,32], index: 2, kind: input, shape index: {}]   ;;  %s2604_s3 = inlined_call_operand.vmem [shape: bf16[2,80,32], index: 3, kind: output, shape index: {}]  }
   0x1   :  { %s2177_s14 = smov 0  }
   0x2 LB: > { %s25_s15 = sadd.s32 1, %s2145_s13  ;;  %p1710_p0 = scmp.ge.s32.totalorder %s2149_s14, 1  ;;  %s2149_s14 = sphi %s2177_s14, %s13_s14   ;;  %s2145_s13 = sphi %s2175_s13, %s2606_s13   ;;  %s2141_s12 = sphi %s2173_s12, %s2605_s12  }
   0x3   : > { %p27_p1 = scmp.ge.s32.totalorder %s25_s15, 2  ;;  %p168_p2 = scmp.lt.s32.totalorder %s2149_s14, 3 }
   0x5   : > { %s2608_s15 = smov (%p27_p1, %s25_s15), 0  ;;  %p169_p3 = pnand %p1710_p0, %p168_p2 }
   0x6   : > { %v2095_v0 = vld [vmem:[%s2602_s1 + $0x8] sm:$0xff] (!%p169_p3)   ;;  %v2151_v1 = vmov (!%p169_p3), 0.0   ;;  %p202_p4 = scmp.lt.s32.totalorder (!%p169_p3), %s2141_s12, 1  ;;  %vm2152_vm0 = vmmov (!%p169_p3), 0   ;;  %vm266_vm1 = vsmask.f32 (!%p169_p3), 7424 }
   0x7   : > { %172 = sbr.rel (%p169_p3) target bundleno = 428 (0x1ac), region = 32  ;;  %1867 = vmatprep.subr.bf16.mxu0 (!%p169_p3), %v2151_v1  ;;  %2065 = vmatprep.subr.bf16.mxu1 (!%p169_p3), %v2151_v1  ;;  %vm317_vm2 = vcmask (!%p169_p3), 130048   ;;  %v2100_v20 = vld [vmem:[%s2602_s1 + $0x10] sm:$0xff] (!%p169_p3)   ;;  %v2101_v24 = vld [vmem:[%s2602_s1] sm:$0xff] (!%p169_p3)   ;;  %vm501_vm3 = vcmask (!%p169_p3), 1046528   ;;  %v2104_v46 = vld [vmem:[%s2602_s1 + $0x18] sm:$0xff] (!%p169_p3)  }
   0x8   : > { %1868 = vmatpush3.bf16.msra.mxu0 (!%p169_p3), %v2095_v0  ;;  %2066 = vmatpush3.bf16.msra.mxu1 (!%p169_p3), %v2095_v0  ;;  %v2106_v50 = vld [vmem:[%s2602_s1 + $0x20] sm:$0xff] (!%p169_p3)   ;;  %vm779_vm4 = vsmask.f32 (!%p169_p3), 6400  ;;  %vm943_vm5 = vcmask (!%p169_p3), 1045504   ;;  %vm1221_vm6 = vsmask.f32 (!%p169_p3), 5376 }
   0x9   : > { %1869 = vmatprep.mubr.msk.bf16.mxu0 (!%p169_p3), %vm2152_vm0, %v2151_v1  ;;  %1881 = vmatprep.mubr.msk.bf16.mxu1 (!%p169_p3), %vm2152_vm0, %v2151_v1  ;;  %vm1385_vm7 = vcmask (!%p169_p3), 1044480   ;;  %vm1588_vm9 = vcmask (!%p169_p3), 257024  }
   0xa   : > { %1911 = vmatprep.subr.bf16.mxu0 (!%p169_p3), %v2151_v1  ;;  %1889 = vmatprep.subr.bf16.mxu1 (!%p169_p3), %v2151_v1 }
   0xe   : > { %s2610_s12 = smov (!%p202_p4, %s2141_s12), 1 }
   0xf   : > { %s2067_s18 = smul.u32 56, %s2610_s12 }
  0x10   : > { %s2068_s17 = smul.u32 40, %s2610_s12 }
  0x11   : > { %s2208_s21 = scalar_lea.vmem %s2601_s0, %s2067_s18 }
  0x12   : > { %v223_v2 = vld [vmem:[%s2208_s21] sm:$0xf]  ;;  %v224_v3 = vld [vmem:[%s2208_s21 + $0x4] sm:$0xf]  ;;  %v2213_v5 = vld [vmem:[%s2208_s21 + $0x8] sm:$0xff]   ;;  %s2556_s20 = scalar_lea.vmem %s2604_s3, %s2068_s17 }
  0x13   : > { %v1713_v4 = vcombine.low %v223_v2, %v224_v3  ;;  %v275_v8 = vshll.u32 %v2213_v5, 16  ;;  %v2217_v9 = vld [vmem:[%s2208_s21 + $0x18] sm:$0xff]   ;;  %v2220_v10 = vld [vmem:[%s2208_s21 + $0x20] sm:$0xff]   ;;  %v2223_v11 = vld [vmem:[%s2208_s21 + $0x10] sm:$0xff]   ;;  %v279_v21 = vshrl.u32 %v2213_v5, 16  ;;  %v503_v48 = vrot.slane %v2213_v5, 1 }
  0x14   : > { %v291_v14 = vshll.u32 %v2217_v9, 16  ;;  %v295_v15 = vshrl.u32 %v2217_v9, 16  ;;  %v299_v16 = vshll.u32 %v2220_v10, 16  ;;  %v2229_v17 = vld [vmem:[%s2208_s21 + $0x28] ss:$0 sps:$4 sm:$0x11]  }
  0x15   : > { %v268_v6 = vshrl.u32 %v1713_v4, 16  ;;  %v270_v7 = vshll.u32 %v1713_v4, 16  ;;  %v277_v13 = vrot.slane %v275_v8, 1  ;;  %v283_v22 = vshll.u32 %v2223_v11, 16  ;;  %v2254_v36 = vld [vmem:[%s2208_s21 + $0x24] sm:$0xff]   ;;  %v2321_v60 = vld [vmem:[%s2208_s21 + $0xc] sm:$0xff]  }
  0x16   : > { %v293_v19 = vrot.slane %v291_v14, 1  ;;  %v301_v23 = vrot.slane %v299_v16, 1  ;;  %v303_v27 = vshrl.u32 %v2220_v10, 16  ;;  %v307_v28 = vshll.u32 %v2229_v17, 16  ;;  %v495_v40 = vld [vmem:[%s2208_s21] sm:$0xe] }
  0x17   : > { %v272_v12 = vrot.slane %v270_v7, 1  ;;  %v281_v30 = vor.u32 %v279_v21, %v277_v13  ;;  %v285_v31 = vrot.slane %v283_v22, 1  ;;  %v287_v35 = vshrl.u32 %v2223_v11, 16  ;;  %v2114_v37 = vld [vmem:[%s2208_s21 + $0x2c] ss:$0 sps:$4 sm:$0x11]  }
  0x18   : > { %v297_v26 = vor.u32 %v295_v15, %v293_v19  ;;  %v305_v32 = vor.u32 %v303_v27, %v301_v23  ;;  %v309_v33 = vrot.slane %v307_v28, 1  ;;  %v665_v41 = vrot.slane %v2254_v36, 1  ;;  %v617_v56 = vld [vmem:[%s2208_s21 + $0x4] sm:$0xe]  ;;  %v2316_v57 = vld [vmem:[%s2208_s21 + $0x8] sm:$0xf] }
  0x19   : > { %v273_v18 = vor.u32 %v272_v12, %v268_v6  ;;  %v286_v34 = vsel %vm266_vm1, %v281_v30, %v285_v31  ;;  %v289_v39 = vor.u32 %v287_v35, %v285_v31  ;;  %v667_v42 = vrot.slane %v2114_v37, 1  ;;  %v2109_v12 = vld [vmem:[%s2602_s1 + $0x28] sm:$0xff]  }
  0x1a   : > { %v302_v29 = vsel %vm266_vm1, %v297_v26, %v301_v23  ;;  %v310_v38 = vsel %vm266_vm1, %v305_v32, %v309_v33  ;;  %v1731_v45 = vcombine.low %v495_v40, %v224_v3  ;;  %v505_v51 = vrot.slane %v2223_v11, 1  ;;  %v2358_v23 = vld [vmem:[%s2208_s21 + $0x1c] sm:$0xff]  }
  0x1b   : > { %v278_v25 = vsel %vm266_vm1, %v273_v18, %v277_v13  ;;  %1882 = vmatmul.mubr.msk.bf16.vlgmr.msra.gmra.mrb[0].mxu1 %vm317_vm2, %v302_v29  ;;  %v2269_v43 = vsel %vm501_vm3, %v665_v41, %v667_v42  ;;  %v294_v44 = vsel %vm266_vm1, %v289_v39, %v293_v19  ;;  %v507_v53 = vrot.slane %v2217_v9, 1  ;;  %v2340_v13 = vld [vmem:[%s2208_s21 + $0x14] sm:$0xff]   ;;  %v2382_v39 = vld [vmem:[%s2208_s21 + $0x2c] ss:$0 sps:$4 sm:$0x33]  }
  0x1c   : > { %1870 = vmatmul.mubr.msk.bf16.vlgmr.msra.gmra.mrb[0].mxu0 %vm317_vm2, %v278_v25  ;;  %1890 = vmatpush3.bf16.msra.mxu1 %v2101_v24  ;;  %v502_v47 = vrot.slane %v1731_v45, 1  ;;  %v506_v52 = vsel %vm501_vm3, %v503_v48, %v505_v51  ;;  %v509_v55 = vrot.slane %v2220_v10, 1  ;;  %v1738_v59 = vcombine.low %v617_v56, %v2316_v57  ;;  %v2111_v19 = vld [vmem:[%s2602_s1 + $0x30] sm:$0xff]  }
  0x1d   : > { %1912 = vmatpush3.bf16.msra.mxu0 %v2100_v20  ;;  %1873 = vmatprep.mubr.msk.bf16.mxu0 %vm2152_vm0, %v2151_v1  ;;  %v508_v54 = vsel %vm501_vm3, %v505_v51, %v507_v53  ;;  %v511_v61 = vrot.slane %v2229_v17, 1  ;;  %v789_v0 = vshrl.u32 %v2321_v60, 16  ;;  %v792_v2 = vshll.u32 %v2321_v60, 16  ;;  %v1059_v51 = vld [vmem:[%s2208_s21 + $0x8] sm:$0xc] }
  0x1e   : > { %1955 = vmatprep.subr.bf16.mxu0 %v2151_v1  ;;  %1885 = vmatprep.mubr.msk.bf16.mxu1 %vm2152_vm0, %v2151_v1  ;;  %v504_v49 = vsel %vm501_vm3, %v502_v47, %v503_v48  ;;  %v510_v58 = vsel %vm501_vm3, %v507_v53, %v509_v55  ;;  %v781_v62 = vshrl.u32 %v1738_v59, 16  ;;  %v784_v63 = vshll.u32 %v1738_v59, 16 }
  0x1f   : > { %1933 = vmatprep.subr.bf16.mxu1 %v2151_v1  ;;  %v658_v3 = vrot.slane %v1738_v59, 1  ;;  %v791_v8 = vrot.slane %v789_v0, 1  ;;  %v798_v15 = vshrl.u32 %v2340_v13, 16  ;;  %v801_v16 = vshll.u32 %v2340_v13, 16  ;;  %v2432_v0 = vld [vmem:[%s2208_s21 + $0x18] sm:$0xff]  }
  0x20   : > { %v783_v6 = vrot.slane %v781_v62, 1  ;;  %v786_v7 = vrot.slane %v784_v63, 2  ;;  %v661_v17 = vrot.slane %v2340_v13, 1  ;;  %v807_v25 = vshrl.u32 %v2358_v23, 16  ;;  %v2120_v63 = vld [vmem:[%s2602_s1 + $0x40] sm:$0xff]  }
  0x21   : > { %v800_v20 = vrot.slane %v798_v15, 1  ;;  %v803_v21 = vrot.slane %v801_v16, 2  ;;  %v810_v26 = vshll.u32 %v2358_v23, 16  ;;  %v663_v27 = vrot.slane %v2358_v23, 1 }
  0x22   : > { %v809_v29 = vrot.slane %v807_v25, 1  ;;  %v816_v33 = vshrl.u32 %v2254_v36, 16  ;;  %v828_v45 = vshll.u32 %v2382_v39, 16 }
  0x23   : > { %1886 = vmatmul.mubr.msk.bf16.gmra.mrb[4].mxu1 %vm317_vm2, %v310_v38  ;;  %v804_v24 = vor.u32 %v803_v21, %v800_v20  ;;  %v812_v30 = vrot.slane %v810_v26, 2  ;;  %v664_v31 = vsel %vm501_vm3, %v661_v17, %v663_v27  ;;  %v666_v40 = vsel %vm501_vm3, %v663_v27, %v665_v41  ;;  %v1379_v26 = vld [vmem:[%s2208_s21 + $0x8] sm:$0x8] }
  0x24   : > { %1874 = vmatmul.mubr.msk.bf16.gmra.mrb[4].mxu0 %vm317_vm2, %v286_v34  ;;  %1891 = vmatprep.mubr.msk.bf16.mxu1 %vm2152_vm0, %v2151_v1  ;;  %v819_v34 = vshll.u32 %v2254_v36, 16  ;;  %v818_v37 = vrot.slane %v816_v33, 1  ;;  %v830_v48 = vrot.slane %v828_v45, 2 }
  0x25   : > { %1877 = vmatprep.mubr.msk.bf16.mxu0 %vm2152_vm0, %v2151_v1  ;;  %v813_v32 = vor.u32 %v812_v30, %v809_v29  ;;  %v1240_v29 = vshrl.u32 %v2432_v0, 16  ;;  %v1243_v30 = vshll.u32 %v2432_v0, 16 }
  0x26   : > { %v821_v38 = vrot.slane %v819_v34, 2 }
  0x27   : > { %v814_v35 = vsel %vm779_vm4, %v804_v24, %v813_v32  ;;  %v1242_v34 = vrot.slane %v1240_v29, 2 }
  0x28   : > { %v822_v42 = vor.u32 %v821_v38, %v818_v37 }
  0x2a   : > { %v823_v41 = vsel %vm779_vm4, %v813_v32, %v822_v42 }
  0x2b   : > { %1892 = vmatmul.mubr.msk.bf16.vlgmr.msra.gmra.mrb[8].mxu1 %vm317_vm2, %v1713_v4  ;;  %v659_v4 = vrot.slane %v2321_v60, 1 }
  0x2c   : > { %1878 = vmatmul.mubr.msk.bf16.gmra.mrb[8].mxu0 %vm317_vm2, %v294_v44  ;;  %1934 = vmatpush3.bf16.msra.mxu1 %v2104_v46  ;;  %v825_v44 = vshrl.u32 %v2382_v39, 16  ;;  %v937_v46 = vld [vmem:[%s2208_s21 + $0x4] sm:$0xc] }
  0x2d   : > { %1913 = vmatprep.mubr.msk.bf16.mxu0 %vm2152_vm0, %v2151_v1  ;;  %1895 = vmatprep.mubr.msk.bf16.mxu1 %vm2152_vm0, %v2151_v1  ;;  %v662_v22 = vsel %vm501_vm3, %v659_v4, %v661_v17 }
  0x2e   : > { %1977 = vmatprep.subr.bf16.mxu1 %v2151_v1  ;;  %v827_v47 = vrot.slane %v825_v44, 1 }
  0x33   : > { %1896 = vmatmul.mubr.msk.bf16.gmra.mrb[12].mxu1 %vm317_vm2, %v2213_v5  ;;  %v512_v5 = vsel %vm501_vm3, %v509_v55, %v511_v61  ;;  %v947_v61 = vrot.slane %v2340_v13, 2 }
  0x34   : > { %1914 = vmatmul.mubr.msk.bf16.vlgmr.msra.gmra.mrb[12].mxu0 %vm317_vm2, %v504_v49  ;;  %1899 = vmatprep.mubr.msk.bf16.mxu1 %vm2152_vm0, %v2151_v1  ;;  %v1757_v49 = vcombine.low %v937_v46, %v2316_v57  ;;  %v2413_v57 = vld [vmem:[%s2208_s21 + $0x10] sm:$0xff]  }
  0x35   : > { %1956 = vmatpush3.bf16.msra.mxu0 %v2106_v50  ;;  %1917 = vmatprep.mubr.msk.bf16.mxu0 %vm2152_vm0, %v2151_v1  ;;  %v831_v50 = vor.u32 %v830_v48, %v827_v47  ;;  %v1231_v16 = vshrl.u32 %v2413_v57, 16  ;;  %v1234_v17 = vshll.u32 %v2413_v57, 16  ;;  %v1387_v38 = vrot.slane %v2413_v57, 3 }
  0x36   : > { %1999 = vmatprep.subr.bf16.mxu0 %v2151_v1  ;;  %v944_v53 = vrot.slane %v1757_v49, 2  ;;  %v1389_v47 = vrot.slane %v2432_v0, 3 }
  0x37   : > { %v832_v55 = vsel %vm779_vm4, %v822_v42, %v831_v50 }
  0x3b   : > { %1900 = vmatmul.mubr.msk.bf16.gmra.mrb[16].mxu1 %vm317_vm2, %v2223_v11  ;;  %v660_v11 = vsel %vm501_vm3, %v658_v3, %v659_v4  ;;  %v1103_v3 = vrot.slane %v2432_v0, 2  ;;  %v949_v4 = vrot.slane %v2358_v23, 2  ;;  %v1233_v23 = vrot.slane %v1231_v16, 2 }
  0x3c   : > { %1918 = vmatmul.mubr.msk.bf16.gmra.mrb[16].mxu0 %vm317_vm2, %v506_v52  ;;  %1903 = vmatprep.mubr.msk.bf16.mxu1 %vm2152_vm0, %v2151_v1  ;;  %v2405_v52 = vld [vmem:[%s2208_s21 + $0xc] sm:$0xf] }
  0x3d   : > { %1921 = vmatprep.mubr.msk.bf16.mxu0 %vm2152_vm0, %v2151_v1  ;;  %v1764_v56 = vcombine.low %v1059_v51, %v2405_v52  ;;  %v1783_v32 = vcombine.low %v1379_v26, %v2405_v52  ;;  %v1390_v51 = vsel %vm1385_vm7, %v1387_v38, %v1389_v47 }
  0x3f   : > { %v1100_v59 = vrot.slane %v1764_v56, 2  ;;  %v1226_v15 = vshll.u32 %v1764_v56, 16  ;;  %v1386_v37 = vrot.slane %v1783_v32, 3 }
  0x41   : > { %v1388_v44 = vsel %vm1385_vm7, %v1386_v37, %v1387_v38 }
  0x43   : > { %1904 = vmatmul.mubr.msk.bf16.gmra.mrb[20].mxu1 %vm317_vm2, %v2217_v9  ;;  %v794_v9 = vrot.slane %v792_v2, 2 }
  0x44   : > { %1922 = vmatmul.mubr.msk.bf16.gmra.mrb[20].mxu0 %vm317_vm2, %v508_v54  ;;  %1907 = vmatprep.mubr.msk.bf16.mxu1 %vm2152_vm0, %v2151_v1  ;;  %v945_v54 = vrot.slane %v2321_v60, 2  ;;  %v1101_v60 = vrot.slane %v2413_v57, 2 }
  0x45   : > { %1925 = vmatprep.mubr.msk.bf16.mxu0 %vm2152_vm0, %v2151_v1  ;;  %v795_v14 = vor.u32 %v794_v9, %v791_v8  ;;  %v951_v9 = vrot.slane %v2254_v36, 2  ;;  %v1223_v36 = vshrl.u32 %v1764_v56, 16 }
  0x46   : > { %v1102_v62 = vsel %vm943_vm5, %v1100_v59, %v1101_v60  ;;  %v948_v2 = vsel %vm943_vm5, %v945_v54, %v947_v61 }
  0x47   : > { %v805_v28 = vsel %vm779_vm4, %v795_v14, %v804_v24  ;;  %v952_v13 = vsel %vm943_vm5, %v949_v4, %v951_v9  ;;  %v1225_v21 = vrot.slane %v1223_v36, 2  ;;  %v1236_v24 = vrot.slane %v1234_v17, 3 }
  0x4b   : > { %1908 = vmatmul.mubr.msk.bf16.gmra.mrb[24].mxu1 %vm317_vm2, %v2220_v10  ;;  %v787_v10 = vor.u32 %v786_v7, %v783_v6  ;;  %v2445_v6 = vld [vmem:[%s2208_s21 + $0x20] sm:$0xff]   ;;  %v950_v7 = vsel %vm943_vm5, %v947_v61, %v949_v4 }
  0x4c   : > { %1926 = vmatmul.mubr.msk.bf16.gmra.mrb[24].mxu0 %vm317_vm2, %v510_v58  ;;  %1935 = vmatprep.mubr.msk.bf16.mxu1 %vm2152_vm0, %v2151_v1  ;;  %v946_v58 = vsel %vm943_vm5, %v944_v53, %v945_v54  ;;  %v1105_v8 = vrot.slane %v2445_v6, 2  ;;  %v1252_v42 = vshll.u32 %v2445_v6, 16  ;;  %v1391_v56 = vrot.slane %v2445_v6, 3 }
  0x4d   : > { %1929 = vmatprep.mubr.msk.bf16.mxu0 %vm2152_vm0, %v2151_v1  ;;  %v796_v18 = vsel %vm779_vm4, %v787_v10, %v795_v14  ;;  %v953_v14 = vrot.slane %v2382_v39, 2 }
  0x4e   : > { %v1392_v59 = vsel %vm1385_vm7, %v1389_v47, %v1391_v56 }
  0x4f   : > { %v954_v20 = vsel %vm943_vm5, %v951_v9, %v953_v14 }
  0x53   : > { %1936 = vmatmul.mubr.msk.bf16.vlgmr.msra.gmra.mrb[28].mxu1 %vm317_vm2, %v660_v11  ;;  %v1106_v11 = vsel %vm943_vm5, %v1103_v3, %v1105_v8 }
  0x54   : > { %1930 = vmatmul.mubr.msk.bf16.gmra.mrb[28].mxu0 %vm317_vm2, %v512_v5  ;;  %1978 = vmatpush3.bf16.msra.mxu1 %v2109_v12  ;;  %v1104_v5 = vsel %vm943_vm5, %v1101_v60, %v1103_v3  ;;  %v2458_v12 = vld [vmem:[%s2208_s21 + $0x28] sm:$0xff]  }
  0x55   : > { %1957 = vmatprep.mubr.msk.bf16.mxu0 %vm2152_vm0, %v2151_v1  ;;  %1939 = vmatprep.mubr.msk.bf16.mxu1 %vm2152_vm0, %v2151_v1  ;;  %v1107_v10 = vrot.slane %v2458_v12, 2  ;;  %v1258_v49 = vshrl.u32 %v2458_v12, 16  ;;  %v1261_v50 = vshll.u32 %v2458_v12, 16 }
  0x56   : > { %2021 = vmatprep.subr.bf16.mxu1 %v2151_v1 }
  0x57   : > { %v1260_v53 = vrot.slane %v1258_v49, 2  ;;  %v1263_v54 = vrot.slane %v1261_v50, 3 }
  0x59   : > { %v1264_v57 = vor.u32 %v1263_v54, %v1260_v53 }
  0x5b   : > { %1940 = vmatmul.mubr.msk.bf16.gmra.mrb[32].mxu1 %vm317_vm2, %v662_v22  ;;  %v1228_v22 = vrot.slane %v1226_v15, 3 }
  0x5c   : > { %1958 = vmatmul.mubr.msk.bf16.vlgmr.msra.gmra.mrb[32].mxu0 %vm317_vm2, %v796_v18  ;;  %1943 = vmatprep.mubr.msk.bf16.mxu1 %vm2152_vm0, %v2151_v1  ;;  %v1108_v18 = vsel %vm943_vm5, %v1105_v8, %v1107_v10 }
  0x5d   : > { %2000 = vmatpush3.bf16.msra.mxu0 %v2111_v19  ;;  %1961 = vmatprep.mubr.msk.bf16.mxu0 %vm2152_vm0, %v2151_v1  ;;  %v2124_v19 = vld [vmem:[%s2208_s21 + $0x30] ss:$0 sps:$4 sm:$0x33]   ;;  %v1229_v27 = vor.u32 %v1228_v22, %v1225_v21 }
  0x5e   : > { %2043 = vmatprep.subr.bf16.mxu0 %v2151_v1  ;;  %v1109_v25 = vrot.slane %v2124_v19, 2 }
  0x63   : > { %1944 = vmatmul.mubr.msk.bf16.gmra.mrb[36].mxu1 %vm317_vm2, %v664_v31  ;;  %v1110_v31 = vsel %vm943_vm5, %v1107_v10, %v1109_v25 }
  0x64   : > { %1962 = vmatmul.mubr.msk.bf16.gmra.mrb[36].mxu0 %vm317_vm2, %v805_v28  ;;  %1947 = vmatprep.mubr.msk.bf16.mxu1 %vm2152_vm0, %v2151_v1  ;;  %v1237_v28 = vor.u32 %v1236_v24, %v1233_v23 }
  0x65   : > { %1965 = vmatprep.mubr.msk.bf16.mxu0 %vm2152_vm0, %v2151_v1 }
  0x66   : > { %v1238_v33 = vsel %vm1221_vm6, %v1229_v27, %v1237_v28 }
  0x6b   : > { %1948 = vmatmul.mubr.msk.bf16.gmra.mrb[40].mxu1 %vm317_vm2, %v666_v40  ;;  %v1249_v40 = vshrl.u32 %v2445_v6, 16 }
  0x6c   : > { %1966 = vmatmul.mubr.msk.bf16.gmra.mrb[40].mxu0 %vm317_vm2, %v814_v35  ;;  %1951 = vmatprep.mubr.msk.bf16.mxu1 %vm2152_vm0, %v2151_v1  ;;  %v1245_v35 = vrot.slane %v1243_v30, 3 }
  0x6d   : > { %1969 = vmatprep.mubr.msk.bf16.mxu0 %vm2152_vm0, %v2151_v1  ;;  %v1251_v46 = vrot.slane %v1249_v40, 2 }
  0x6e   : > { %v1246_v39 = vor.u32 %v1245_v35, %v1242_v34 }
  0x70   : > { %v1247_v45 = vsel %vm1221_vm6, %v1237_v28, %v1246_v39 }
  0x73   : > { %1952 = vmatmul.mubr.msk.bf16.gmra.mrb[44].mxu1 %vm317_vm2, %v2269_v43  ;;  %v2117_v43 = vld [vmem:[%s2602_s1 + $0x38] sm:$0xff]  }
  0x74   : > { %1970 = vmatmul.mubr.msk.bf16.gmra.mrb[44].mxu0 %vm317_vm2, %v823_v41  ;;  %1979 = vmatprep.mubr.msk.bf16.mxu1 %vm2152_vm0, %v2151_v1  ;;  %v1254_v41 = vrot.slane %v1252_v42, 3 }
  0x75   : > { %1973 = vmatprep.mubr.msk.bf16.mxu0 %vm2152_vm0, %v2151_v1 }
  0x76   : > { %v1255_v48 = vor.u32 %v1254_v41, %v1251_v46 }
  0x78   : > { %v1256_v52 = vsel %vm1221_vm6, %v1246_v39, %v1255_v48  ;;  %v1265_v60 = vsel %vm1221_vm6, %v1255_v48, %v1264_v57 }
  0x7b   : > { %1980 = vmatmul.mubr.msk.bf16.vlgmr.msra.gmra.mrb[48].mxu1 %vm317_vm2, %v946_v58 }
  0x7c   : > { %1974 = vmatmul.mubr.msk.bf16.gmra.mrb[48].mxu0 %vm317_vm2, %v832_v55  ;;  %2022 = vmatpush3.bf16.msra.mxu1 %v2117_v43  ;;  %v2126_v55 = vld [vmem:[%s2208_s21 + $0x30] ss:$0 sps:$4 sm:$0x77]  }
  0x7d   : > { %2001 = vmatprep.mubr.msk.bf16.mxu0 %vm2152_vm0, %v2151_v1  ;;  %1983 = vmatprep.mubr.msk.bf16.mxu1 %vm2152_vm0, %v2151_v1  ;;  %v1267_v58 = vshrl.u32 %v2126_v55, 16  ;;  %v1270_v43 = vshll.u32 %v2126_v55, 16  ;;  %v1395_v4 = vrot.slane %v2126_v55, 3 }
  0x7f   : > { %v1269_v61 = vrot.slane %v1267_v58, 2 }
  0x83   : > { %1984 = vmatmul.mubr.msk.bf16.gmra.mrb[52].mxu1 %vm317_vm2, %v948_v2 }
  0x84   : > { %2002 = vmatmul.mubr.msk.bf16.vlgmr.msra.gmra.mrb[52].mxu0 %vm317_vm2, %v1102_v62  ;;  %1987 = vmatprep.mubr.msk.bf16.mxu1 %vm2152_vm0, %v2151_v1  ;;  %v1272_v62 = vrot.slane %v1270_v43, 3 }
  0x85   : > { %2044 = vmatpush3.bf16.msra.mxu0 %v2120_v63  ;;  %2005 = vmatprep.mubr.msk.bf16.mxu0 %vm2152_vm0, %v2151_v1  ;;  %v1393_v63 = vrot.slane %v2458_v12, 3 }
  0x86   : > { %v1273_v0 = vor.u32 %v1272_v62, %v1269_v61 }
  0x87   : > { %v1394_v2 = vsel %vm1385_vm7, %v1391_v56, %v1393_v63 }
  0x88   : > { %v1274_v3 = vsel %vm1221_vm6, %v1264_v57, %v1273_v0 }
  0x8b   : > { %1988 = vmatmul.mubr.msk.bf16.gmra.mrb[56].mxu1 %vm317_vm2, %v950_v7 }
  0x8c   : > { %2006 = vmatmul.mubr.msk.bf16.gmra.mrb[56].mxu0 %vm317_vm2, %v1104_v5  ;;  %1991 = vmatprep.mubr.msk.bf16.mxu1 %vm2152_vm0, %v2151_v1  ;;  %v1396_v5 = vsel %vm1385_vm7, %v1393_v63, %v1395_v4 }
  0x8d   : > { %2009 = vmatprep.mubr.msk.bf16.mxu0 %vm2152_vm0, %v2151_v1 }
  0x93   : > { %1992 = vmatmul.mubr.msk.bf16.gmra.mrb[60].mxu1 %vm317_vm2, %v952_v13 }
  0x94   : > { %2010 = vmatmul.mubr.msk.bf16.gmra.mrb[60].mxu0 %vm317_vm2, %v1106_v11  ;;  %1995 = vmatprep.mubr.msk.bf16.mxu1 %vm2152_vm0, %v2151_v1 }
  0x95   : > { %2013 = vmatprep.mubr.msk.bf16.mxu0 %vm2152_vm0, %v2151_v1 }
  0x9b   : > { %1996 = vmatmul.mubr.msk.bf16.gmra.mrb[64].mxu1 %vm317_vm2, %v954_v20 }
  0x9c   : > { %2014 = vmatmul.mubr.msk.bf16.gmra.mrb[64].mxu0 %vm317_vm2, %v1108_v18  ;;  %2023 = vmatprep.mubr.msk.bf16.mxu1 %vm2152_vm0, %v2151_v1 }
  0x9d   : > { %2017 = vmatprep.mubr.msk.bf16.mxu0 %vm2152_vm0, %v2151_v1 }
  0xa3   : > { %2024 = vmatmul.mubr.msk.bf16.vlgmr.msra.gmra.mrb[68].mxu1 %vm317_vm2, %v1238_v33 }
  0xa4   : > { %2018 = vmatmul.mubr.msk.bf16.gmra.mrb[68].mxu0 %vm317_vm2, %v1110_v31  ;;  %2027 = vmatprep.mubr.msk.bf16.mxu1 %vm2152_vm0, %v2151_v1 }
  0xa5   : > { %2045 = vmatprep.mubr.msk.bf16.mxu0 %vm2152_vm0, %v2151_v1 }
  0xab   : > { %2028 = vmatmul.mubr.msk.bf16.gmra.mrb[72].mxu1 %vm317_vm2, %v1247_v45 }
  0xac   : > { %2046 = vmatmul.mubr.msk.bf16.vlgmr.msra.gmra.mrb[72].mxu0 %vm317_vm2, %v1388_v44  ;;  %2031 = vmatprep.mubr.msk.bf16.mxu1 %vm2152_vm0, %v2151_v1 }
  0xad   : > { %2049 = vmatprep.mubr.msk.bf16.mxu0 %vm2152_vm0, %v2151_v1 }
  0xb3   : > { %2032 = vmatmul.mubr.msk.bf16.gmra.mrb[76].mxu1 %vm317_vm2, %v1256_v52 }
  0xb4   : > { %2050 = vmatmul.mubr.msk.bf16.gmra.mrb[76].mxu0 %vm317_vm2, %v1390_v51  ;;  %2035 = vmatprep.mubr.msk.bf16.mxu1 %vm2152_vm0, %v2151_v1 }
  0xb5   : > { %2053 = vmatprep.mubr.msk.bf16.mxu0 %vm2152_vm0, %v2151_v1 }
  0xbb   : > { %2036 = vmatmul.mubr.msk.bf16.gmra.mrb[80].mxu1 %vm317_vm2, %v1265_v60 }
  0xbc   : > { %2054 = vmatmul.mubr.msk.bf16.gmra.mrb[80].mxu0 %vm317_vm2, %v1392_v59  ;;  %2039 = vmatprep.mubr.msk.bf16.mxu1 %vm2152_vm0, %v2151_v1 }
  0xbd   : > { %2057 = vmatprep.mubr.msk.bf16.mxu0 %vm2152_vm0, %v2151_v1 }
  0xc3   : > { %2040 = vmatmul.mubr.msk.bf16.gmra.mrb[84].mxu1 %vm317_vm2, %v1274_v3 }
  0xc4   : > { %2058 = vmatmul.mubr.msk.bf16.gmra.mrb[84].mxu0 %vm317_vm2, %v1394_v2 }
  0xc5   : > { %2061 = vmatprep.mubr.msk.bf16.mxu0 %vm2152_vm0, %v2151_v1 }
  0xcc   : > { %2062 = vmatmul.mubr.msk.bf16.gmra.mrb[88].mxu0 %vm317_vm2, %v1396_v5 }
  0xee   : > { %v391_v9 = vpop.f32.mrb[0].mxu1 }
  0xef   : > { %v367_v6 = vpop.f32.mrb[0].mxu0  ;;  %v1883_v12 = vpop.f32.mrb[1].mxu1 }
  0xf0   : > { %v1871_v7 = vpop.f32.mrb[1].mxu0  ;;  %v394_v13 = vpop.f32.mrb[2].mxu1 }
  0xf1   : > { %v370_v8 = vpop.f32.mrb[2].mxu0  ;;  %v1884_v10 = vpop.f32.mrb[3].mxu1 }
  0xf2   : > { %v1872_v11 = vpop.f32.mrb[3].mxu0 }
  0xf6   : > { %v399_v16 = vpop.f32.mrb[4].mxu1 }
  0xf7   : > { %v375_v14 = vpop.f32.mrb[4].mxu0  ;;  %v1887_v17 = vpop.f32.mrb[5].mxu1 }
  0xf8   : > { %v1875_v36 = vpop.f32.mrb[5].mxu0  ;;  %v402_v18 = vpop.f32.mrb[6].mxu1 }
  0xf9   : > { %v378_v15 = vpop.f32.mrb[6].mxu0  ;;  %v1888_v19 = vpop.f32.mrb[7].mxu1 }
  0xfa   : > { %v1876_v1 = vpop.f32.mrb[7].mxu0 }
  0xfe   : > { %v456_v22 = vpop.f32.mrb[8].mxu1 }
  0xff   : > { %v383_v20 = vpop.f32.mrb[8].mxu0  ;;  %v457_v24 = vadd.f32 %v456_v22, %v367_v6  ;;  %v1893_v25 = vpop.f32.mrb[9].mxu1 }
 0x100   : > { %v1879_v21 = vpop.f32.mrb[9].mxu0  ;;  %v459_v27 = vpop.f32.mrb[10].mxu1 }
 0x101   : > { %v386_v23 = vpop.f32.mrb[10].mxu0  ;;  %v460_v28 = vadd.f32 %v459_v27, %v370_v8  ;;  %v1894_v29 = vpop.f32.mrb[11].mxu1 }
 0x102   : > { %v1880_v26 = vpop.f32.mrb[11].mxu0 }
 0x106   : > { %v464_v33 = vpop.f32.mrb[12].mxu1 }
 0x107   : > { %v568_v30 = vpop.f32.mrb[12].mxu0  ;;  %v465_v35 = vadd.f32 %v464_v33, %v375_v14  ;;  %v1897_v37 = vpop.f32.mrb[13].mxu1 }
 0x108   : > { %v607_v31 = vadd.f32 %v568_v30, %v457_v24  ;;  %v1915_v32 = vpop.f32.mrb[13].mxu0  ;;  %v467_v40 = vpop.f32.mrb[14].mxu1 }
 0x109   : > { %v571_v34 = vpop.f32.mrb[14].mxu0  ;;  %v468_v42 = vadd.f32 %v467_v40, %v378_v15  ;;  %v1898_v44 = vpop.f32.mrb[15].mxu1 }
 0x10a   : > { %v608_v38 = vadd.f32 %v571_v34, %v460_v28  ;;  %v1916_v39 = vpop.f32.mrb[15].mxu0 }
 0x10e   : > { %v472_v47 = vpop.f32.mrb[16].mxu1 }
 0x10f   : > { %v576_v45 = vpop.f32.mrb[16].mxu0  ;;  %v473_v49 = vadd.f32 %v472_v47, %v383_v20  ;;  %v1901_v50 = vpop.f32.mrb[17].mxu1 }
 0x110   : > { %v609_v46 = vadd.f32 %v576_v45, %v465_v35  ;;  %v1919_v41 = vpop.f32.mrb[17].mxu0  ;;  %v475_v53 = vpop.f32.mrb[18].mxu1 }
 0x111   : > { %v579_v48 = vpop.f32.mrb[18].mxu0  ;;  %v476_v54 = vadd.f32 %v475_v53, %v386_v23  ;;  %v1902_v55 = vpop.f32.mrb[19].mxu1 }
 0x112   : > { %v610_v51 = vadd.f32 %v579_v48, %v468_v42  ;;  %v1920_v52 = vpop.f32.mrb[19].mxu0 }
 0x116   : > { %v480_v43 = vpop.f32.mrb[20].mxu1 }
 0x117   : > { %v584_v56 = vpop.f32.mrb[20].mxu0  ;;  %v481_v60 = vadd.f32 %v480_v43, %v391_v9  ;;  %v1905_v61 = vpop.f32.mrb[21].mxu1 }
 0x118   : > { %v611_v57 = vadd.f32 %v584_v56, %v473_v49  ;;  %v1923_v58 = vpop.f32.mrb[21].mxu0  ;;  %v483_v0 = vpop.f32.mrb[22].mxu1 }
 0x119   : > { %v587_v59 = vpop.f32.mrb[22].mxu0  ;;  %v484_v2 = vadd.f32 %v483_v0, %v394_v13  ;;  %v1906_v3 = vpop.f32.mrb[23].mxu1 }
 0x11a   : > { %v612_v62 = vadd.f32 %v587_v59, %v476_v54  ;;  %v1924_v63 = vpop.f32.mrb[23].mxu0 }
 0x11e   : > { %v488_v7 = vpop.f32.mrb[24].mxu1 }
 0x11f   : > { %v592_v4 = vpop.f32.mrb[24].mxu0  ;;  %v489_v11 = vadd.f32 %v488_v7, %v399_v16  ;;  %v1909_v12 = vpop.f32.mrb[25].mxu1 }
 0x120   : > { %v613_v5 = vadd.f32 %v592_v4, %v481_v60  ;;  %v1927_v6 = vpop.f32.mrb[25].mxu0  ;;  %v491_v36 = vpop.f32.mrb[26].mxu1 }
 0x121   : > { %v595_v8 = vpop.f32.mrb[26].mxu0  ;;  %v492_v15 = vadd.f32 %v491_v36, %v402_v18  ;;  %v1910_v1 = vpop.f32.mrb[27].mxu1 }
 0x122   : > { %v614_v10 = vadd.f32 %v595_v8, %v484_v2  ;;  %v1928_v14 = vpop.f32.mrb[27].mxu0 }
 0x126   : > { %v724_v20 = vpop.f32.mrb[28].mxu1 }
 0x127   : > { %v600_v17 = vpop.f32.mrb[28].mxu0  ;;  %v763_v22 = vadd.f32 %v724_v20, %v607_v31  ;;  %v1937_v13 = vpop.f32.mrb[29].mxu1 }
 0x128   : > { %v615_v9 = vadd.f32 %v600_v17, %v489_v11  ;;  %v1931_v19 = vpop.f32.mrb[29].mxu0  ;;  %v727_v25 = vpop.f32.mrb[30].mxu1 }
 0x129   : > { %v603_v21 = vpop.f32.mrb[30].mxu0  ;;  %v764_v26 = vadd.f32 %v727_v25, %v608_v38  ;;  %v1938_v27 = vpop.f32.mrb[31].mxu1 }
 0x12a   : > { %v616_v23 = vadd.f32 %v603_v21, %v492_v15  ;;  %v1932_v24 = vpop.f32.mrb[31].mxu0 }
 0x12e   : > { %v732_v30 = vpop.f32.mrb[32].mxu1 }
 0x12f   : > { %v888_v28 = vpop.f32.mrb[32].mxu0  ;;  %v765_v33 = vadd.f32 %v732_v30, %v609_v46  ;;  %v1941_v18 = vpop.f32.mrb[33].mxu1 }
 0x130   : > { %v927_v16 = vadd.f32 %v888_v28, %v763_v22  ;;  %v1959_v29 = vpop.f32.mrb[33].mxu0  ;;  %v735_v37 = vpop.f32.mrb[34].mxu1 }
 0x131   : > { %v891_v32 = vpop.f32.mrb[34].mxu0  ;;  %v766_v39 = vadd.f32 %v735_v37, %v610_v51  ;;  %v1942_v40 = vpop.f32.mrb[35].mxu1 }
 0x132   : > { %v928_v34 = vadd.f32 %v891_v32, %v764_v26  ;;  %v1960_v35 = vpop.f32.mrb[35].mxu0 }
 0x136   : > { %v740_v45 = vpop.f32.mrb[36].mxu1 }
 0x137   : > { %v896_v42 = vpop.f32.mrb[36].mxu0  ;;  %v767_v47 = vadd.f32 %v740_v45, %v611_v57  ;;  %v1945_v38 = vpop.f32.mrb[37].mxu1 }
 0x138   : > { %v929_v31 = vadd.f32 %v896_v42, %v765_v33  ;;  %v1963_v44 = vpop.f32.mrb[37].mxu0  ;;  %v743_v50 = vpop.f32.mrb[38].mxu1 }
 0x139   : > { %v899_v41 = vpop.f32.mrb[38].mxu0  ;;  %v768_v52 = vadd.f32 %v743_v50, %v612_v62  ;;  %v1946_v53 = vpop.f32.mrb[39].mxu1 }
 0x13a   : > { %v930_v48 = vadd.f32 %v899_v41, %v766_v39  ;;  %v1964_v49 = vpop.f32.mrb[39].mxu0 }
 0x13e   : > { %v748_v56 = vpop.f32.mrb[40].mxu1 }
 0x13f   : > { %v904_v54 = vpop.f32.mrb[40].mxu0  ;;  %v769_v43 = vadd.f32 %v748_v56, %v613_v5  ;;  %v1949_v51 = vpop.f32.mrb[41].mxu1 }
 0x140   : > { %v931_v46 = vadd.f32 %v904_v54, %v767_v47  ;;  %v1967_v55 = vpop.f32.mrb[41].mxu0  ;;  %v751_v61 = vpop.f32.mrb[42].mxu1 }
 0x141   : > { %v907_v58 = vpop.f32.mrb[42].mxu0  ;;  %v770_v63 = vadd.f32 %v751_v61, %v614_v10  ;;  %v1950_v0 = vpop.f32.mrb[43].mxu1 }
 0x142   : > { %v932_v59 = vadd.f32 %v907_v58, %v768_v52  ;;  %v1968_v60 = vpop.f32.mrb[43].mxu0 }
 0x146   : > { %v756_v4 = vpop.f32.mrb[44].mxu1 }
 0x147   : > { %v912_v2 = vpop.f32.mrb[44].mxu0  ;;  %v771_v7 = vadd.f32 %v756_v4, %v615_v9  ;;  %v1953_v62 = vpop.f32.mrb[45].mxu1 }
 0x148   : > { %v933_v57 = vadd.f32 %v912_v2, %v769_v43  ;;  %v1971_v3 = vpop.f32.mrb[45].mxu0  ;;  %v759_v12 = vpop.f32.mrb[46].mxu1 }
 0x149   : > { %v915_v6 = vpop.f32.mrb[46].mxu0  ;;  %v772_v14 = vadd.f32 %v759_v12, %v616_v23  ;;  %v1954_v36 = vpop.f32.mrb[47].mxu1 }
 0x14a   : > { %v934_v8 = vadd.f32 %v915_v6, %v770_v63  ;;  %v1972_v11 = vpop.f32.mrb[47].mxu0 }
 0x14e   : > { %v1010_v17 = vpop.f32.mrb[48].mxu1 }
 0x14f   : > { %v920_v15 = vpop.f32.mrb[48].mxu0  ;;  %v1049_v20 = vadd.f32 %v1010_v17, %v927_v16  ;;  %v1981_v10 = vpop.f32.mrb[49].mxu1 }
 0x150   : > { %v935_v5 = vadd.f32 %v920_v15, %v771_v7  ;;  %v1975_v1 = vpop.f32.mrb[49].mxu0  ;;  %v1013_v13 = vpop.f32.mrb[50].mxu1 }
 0x151   : > { %v923_v19 = vpop.f32.mrb[50].mxu0  ;;  %v1050_v24 = vadd.f32 %v1013_v13, %v928_v34  ;;  %v1982_v25 = vpop.f32.mrb[51].mxu1 }
 0x152   : > { %v936_v21 = vadd.f32 %v923_v19, %v772_v14  ;;  %v1976_v22 = vpop.f32.mrb[51].mxu0 }
 0x156   : > { %v1018_v28 = vpop.f32.mrb[52].mxu1 }
 0x157   : > { %v1166_v26 = vpop.f32.mrb[52].mxu0  ;;  %v1051_v30 = vadd.f32 %v1018_v28, %v929_v31  ;;  %v1985_v23 = vpop.f32.mrb[53].mxu1 }
 0x158   : > { %v1205_v9 = vadd.f32 %v1166_v26, %v1049_v20  ;;  %v2003_v27 = vpop.f32.mrb[53].mxu0  ;;  %v1021_v18 = vpop.f32.mrb[54].mxu1 }
 0x159   : > { %v1169_v29 = vpop.f32.mrb[54].mxu0  ;;  %v1052_v35 = vadd.f32 %v1021_v18, %v930_v48  ;;  %v1986_v37 = vpop.f32.mrb[55].mxu1 }
 0x15a   : > { %v1206_v32 = vadd.f32 %v1169_v29, %v1050_v24  ;;  %v2004_v33 = vpop.f32.mrb[55].mxu0 }
 0x15e   : > { %v1026_v42 = vpop.f32.mrb[56].mxu1 }
 0x15f   : > { %v1174_v39 = vpop.f32.mrb[56].mxu0  ;;  %v1053_v45 = vadd.f32 %v1026_v42, %v931_v46  ;;  %v1989_v34 = vpop.f32.mrb[57].mxu1 }
 0x160   : > { %v1207_v16 = vadd.f32 %v1174_v39, %v1051_v30  ;;  %v2007_v40 = vpop.f32.mrb[57].mxu0  ;;  %v1029_v38 = vpop.f32.mrb[58].mxu1 }
 0x161   : > { %v1177_v44 = vpop.f32.mrb[58].mxu0  ;;  %v1054_v49 = vadd.f32 %v1029_v38, %v932_v59  ;;  %v1990_v50 = vpop.f32.mrb[59].mxu1 }
 0x162   : > { %v1208_v41 = vadd.f32 %v1177_v44, %v1052_v35  ;;  %v2008_v47 = vpop.f32.mrb[59].mxu0 }
 0x166   : > { %v1034_v54 = vpop.f32.mrb[60].mxu1 }
 0x167   : > { %v1182_v52 = vpop.f32.mrb[60].mxu0  ;;  %v1055_v48 = vadd.f32 %v1034_v54, %v933_v57  ;;  %v1993_v56 = vpop.f32.mrb[61].mxu1 }
 0x168   : > { %v2533_v31 = vadd.f32 %v1182_v52, %v1053_v45  ;;  %v2011_v53 = vpop.f32.mrb[61].mxu0  ;;  %v1037_v51 = vpop.f32.mrb[62].mxu1 }
 0x169   : > { %v1185_v55 = vpop.f32.mrb[62].mxu0  ;;  %v1056_v60 = vadd.f32 %v1037_v51, %v934_v8  ;;  %v1994_v46 = vpop.f32.mrb[63].mxu1 }
 0x16a   : > { %v2535_v58 = vadd.f32 %v1185_v55, %v1054_v49  ;;  %v2012_v43 = vpop.f32.mrb[63].mxu0 }
 0x16e   : > { %v1042_v59 = vpop.f32.mrb[64].mxu1 }
 0x16f   : > { %v1190_v61 = vpop.f32.mrb[64].mxu0  ;;  %v1057_v3 = vadd.f32 %v1042_v59, %v935_v5  ;;  %v1997_v4 = vpop.f32.mrb[65].mxu1 }
 0x170   : > { %v2537_v63 = vadd.f32 %v1190_v61, %v1055_v48  ;;  %v2015_v0 = vpop.f32.mrb[65].mxu0  ;;  %v1045_v62 = vpop.f32.mrb[66].mxu1 }
 0x171   : > { %v1193_v2 = vpop.f32.mrb[66].mxu0  ;;  %v1058_v57 = vadd.f32 %v1045_v62, %v936_v21  ;;  %v1998_v11 = vpop.f32.mrb[67].mxu1  ;;  %v2548_v21 = vld [vmem:[%s2603_s2] ss:$0 sm:$0xff] }
 0x172   : > { %v2539_v6 = vadd.f32 %v1193_v2, %v1056_v60  ;;  %v2016_v7 = vpop.f32.mrb[67].mxu0 }
 0x176   : > { %v1330_v8 = vpop.f32.mrb[68].mxu1 }
 0x177   : > { %v1198_v12 = vpop.f32.mrb[68].mxu0  ;;  %v1369_v1 = vadd.f32 %v1330_v8, %v1205_v9  ;;  %v2025_v17 = vpop.f32.mrb[69].mxu1 }
 0x178   : > { %v2541_v14 = vadd.f32 %v1198_v12, %v1057_v3  ;;  %v2019_v36 = vpop.f32.mrb[69].mxu0  ;;  %v1333_v5 = vpop.f32.mrb[70].mxu1 }
 0x179   : > { %v1201_v15 = vpop.f32.mrb[70].mxu0  ;;  %v1370_v10 = vadd.f32 %v1333_v5, %v1206_v32  ;;  %v2026_v22 = vpop.f32.mrb[71].mxu1 }
 0x17a   : > { %v2543_v19 = vadd.f32 %v1201_v15, %v1058_v57  ;;  %v2020_v20 = vpop.f32.mrb[71].mxu0 }
 0x17e   : > { %v1338_v26 = vpop.f32.mrb[72].mxu1 }
 0x17f   : > { %v1452_v13 = vpop.f32.mrb[72].mxu0  ;;  %v1371_v28 = vadd.f32 %v1338_v26, %v1207_v16  ;;  %v2029_v29 = vpop.f32.mrb[73].mxu1 }
 0x180   : > { %v1491_v24 = vadd.f32 %v1452_v13, %v1369_v1  ;;  %v2047_v25 = vpop.f32.mrb[73].mxu0  ;;  %v1341_v33 = vpop.f32.mrb[74].mxu1 }
 0x181   : > { %v1455_v27 = vpop.f32.mrb[74].mxu0  ;;  %v1372_v18 = vadd.f32 %v1341_v33, %v1208_v41  ;;  %v2030_v37 = vpop.f32.mrb[75].mxu1 }
 0x182   : > { %v1508_v9 = vadd.f32 %v2548_v21, %v1491_v24  ;;  %v1492_v30 = vadd.f32 %v1455_v27, %v1370_v10  ;;  %v2048_v23 = vpop.f32.mrb[75].mxu0 }
 0x184   : > { %vm1518_vm8 = vcmp.gt.f32.partialorder %v1508_v9, 0.0  ;;  %v1528_v32 = vmul.f32 0.1, %v1508_v9  ;;  %v1509_v35 = vadd.f32 %v2548_v21, %v1492_v30 }
 0x186   : > { %v1538_v39 = vsel %vm1518_vm8, %v1508_v9, %v1528_v32  ;;  %vm1519_vm10 = vcmp.gt.f32.partialorder %v1509_v35, 0.0  ;;  %v1529_v16 = vmul.f32 0.1, %v1509_v35  ;;  %v1346_v47 = vpop.f32.mrb[76].mxu1 }
 0x187   : > { %v1803_v40 = vpack.c.bf16 %v1538_v39, %v1538_v39  ;;  %v1460_v42 = vpop.f32.mrb[76].mxu0  ;;  %v1373_v49 = vadd.f32 %v1346_v47, %v2533_v31  ;;  %v2033_v52 = vpop.f32.mrb[77].mxu1 }
 0x188   : > { %v1539_v44 = vsel %vm1519_vm10, %v1509_v35, %v1529_v16  ;;  %v1493_v45 = vadd.f32 %v1460_v42, %v1371_v28  ;;  %v2051_v34 = vpop.f32.mrb[77].mxu0  ;;  %v1349_v55 = vpop.f32.mrb[78].mxu1 }
 0x189   : > { %1589 = vst.msk [vmem:[%s2556_s20] sm:$0xf] %vm1588_vm9, %v1803_v40  ;;  %v1804_v41 = vpack.c.bf16 %v1539_v44, %v1539_v44  ;;  %v1463_v38 = vpop.f32.mrb[78].mxu0  ;;  %v1374_v56 = vadd.f32 %v1349_v55, %v2535_v58  ;;  %v2034_v51 = vpop.f32.mrb[79].mxu1 }
 0x18a   : > { %v1510_v50 = vadd.f32 %v2548_v21, %v1493_v45  ;;  %v1494_v53 = vadd.f32 %v1463_v38, %v1372_v18  ;;  %v2052_v54 = vpop.f32.mrb[79].mxu0 }
 0x18b   : > { %1590 = vst.msk [vmem:[%s2556_s20 + $0x4] sm:$0xf] %vm1588_vm9, %v1804_v41 }
 0x18c   : > { %vm1520_vm11 = vcmp.gt.f32.partialorder %v1510_v50, 0.0  ;;  %v1530_v48 = vmul.f32 0.1, %v1510_v50  ;;  %v1511_v43 = vadd.f32 %v2548_v21, %v1494_v53 }
 0x18e   : > { %v1540_v60 = vsel %vm1520_vm11, %v1510_v50, %v1530_v48  ;;  %vm1521_vm12 = vcmp.gt.f32.partialorder %v1511_v43, 0.0  ;;  %v1531_v31 = vmul.f32 0.1, %v1511_v43  ;;  %v1354_v4 = vpop.f32.mrb[80].mxu1 }
 0x18f   : > { %v1805_v46 = vpack.c.bf16 %v1540_v60, %v1540_v60  ;;  %v1468_v61 = vpop.f32.mrb[80].mxu0  ;;  %v1375_v62 = vadd.f32 %v1354_v4, %v2537_v63  ;;  %v2037_v57 = vpop.f32.mrb[81].mxu1 }
 0x190   : > { %v1541_v0 = vsel %vm1521_vm12, %v1511_v43, %v1531_v31  ;;  %v1495_v59 = vadd.f32 %v1468_v61, %v1373_v49  ;;  %v2055_v2 = vpop.f32.mrb[81].mxu0  ;;  %v1357_v36 = vpop.f32.mrb[82].mxu1 }
 0x191   : > { %1591 = vst.msk [vmem:[%s2556_s20 + $0x8] sm:$0xf] %vm1588_vm9, %v1805_v46  ;;  %v1806_v3 = vpack.c.bf16 %v1541_v0, %v1541_v0  ;;  %v1471_v7 = vpop.f32.mrb[82].mxu0  ;;  %v1376_v15 = vadd.f32 %v1357_v36, %v2539_v6  ;;  %v2038_v17 = vpop.f32.mrb[83].mxu1 }
 0x192   : > { %v1512_v58 = vadd.f32 %v2548_v21, %v1495_v59  ;;  %v1496_v11 = vadd.f32 %v1471_v7, %v1374_v56  ;;  %v2056_v12 = vpop.f32.mrb[83].mxu0 }
 0x193   : > { %1592 = vst.msk [vmem:[%s2556_s20 + $0xc] sm:$0xf] %vm1588_vm9, %v1806_v3 }
 0x194   : > { %vm1522_vm13 = vcmp.gt.f32.partialorder %v1512_v58, 0.0  ;;  %v1532_v8 = vmul.f32 0.1, %v1512_v58  ;;  %v1513_v1 = vadd.f32 %v2548_v21, %v1496_v11 }
 0x196   : > { %v1542_v20 = vsel %vm1522_vm13, %v1512_v58, %v1532_v8  ;;  %vm1523_vm14 = vcmp.gt.f32.partialorder %v1513_v1, 0.0  ;;  %v1533_v63 = vmul.f32 0.1, %v1513_v1  ;;  %v1362_v26 = vpop.f32.mrb[84].mxu1 }
 0x197   : > { %v1807_v5 = vpack.c.bf16 %v1542_v20, %v1542_v20  ;;  %v1476_v10 = vpop.f32.mrb[84].mxu0  ;;  %v1377_v28 = vadd.f32 %v1362_v26, %v2541_v14  ;;  %v2041_v9 = vpop.f32.mrb[85].mxu1 }
 0x198   : > { %v1543_v22 = vsel %vm1523_vm14, %v1513_v1, %v1533_v63  ;;  %v1497_v13 = vadd.f32 %v1476_v10, %v1375_v62  ;;  %v2059_v24 = vpop.f32.mrb[85].mxu0  ;;  %v1365_v23 = vpop.f32.mrb[86].mxu1 }
 0x199   : > { %1593 = vst.msk [vmem:[%s2556_s20 + $0x10] sm:$0xf] %vm1588_vm9, %v1807_v5  ;;  %v1808_v25 = vpack.c.bf16 %v1543_v22, %v1543_v22  ;;  %v1479_v27 = vpop.f32.mrb[86].mxu0  ;;  %v1378_v32 = vadd.f32 %v1365_v23, %v2543_v19  ;;  %v2042_v35 = vpop.f32.mrb[87].mxu1 }
 0x19a   : > { %v1514_v6 = vadd.f32 %v2548_v21, %v1497_v13  ;;  %v1498_v29 = vadd.f32 %v1479_v27, %v1376_v15  ;;  %v2060_v30 = vpop.f32.mrb[87].mxu0 }
 0x19b   : > { %1594 = vst.msk [vmem:[%s2556_s20 + $0x14] sm:$0xf] %vm1588_vm9, %v1808_v25 }
 0x19c   : > { %vm1524_vm15 = vcmp.gt.f32.partialorder %v1514_v6, 0.0  ;;  %v1534_v33 = vmul.f32 0.1, %v1514_v6  ;;  %v1515_v18 = vadd.f32 %v2548_v21, %v1498_v29 }
 0x19e   : > { %v1544_v37 = vsel %vm1524_vm15, %v1514_v6, %v1534_v33  ;;  %vm1525_vm0 = vcmp.gt.f32.partialorder %v1515_v18, 0.0  ;;  %v1535_v14 = vmul.f32 0.1, %v1515_v18 }
 0x19f   : > { %v1809_v39 = vpack.c.bf16 %v1544_v37, %v1544_v37  ;;  %v1484_v16 = vpop.f32.mrb[88].mxu0 }
 0x1a0   : > { %v1545_v40 = vsel %vm1525_vm0, %v1515_v18, %v1535_v14  ;;  %v1499_v42 = vadd.f32 %v1484_v16, %v1377_v28  ;;  %v2063_v44 = vpop.f32.mrb[89].mxu0 }
 0x1a1   : > { %1595 = vst.msk [vmem:[%s2556_s20 + $0x18] sm:$0xf] %vm1588_vm9, %v1809_v39  ;;  %v1810_v45 = vpack.c.bf16 %v1545_v40, %v1545_v40  ;;  %v1487_v34 = vpop.f32.mrb[90].mxu0 }
 0x1a2   : > { %v1516_v19 = vadd.f32 %v2548_v21, %v1499_v42  ;;  %v1500_v41 = vadd.f32 %v1487_v34, %v1378_v32  ;;  %v2064_v47 = vpop.f32.mrb[91].mxu0 }
 0x1a3   : > { %1596 = vst.msk [vmem:[%s2556_s20 + $0x1c] sm:$0xf] %vm1588_vm9, %v1810_v45 }
 0x1a4   : > { %vm1526_vm1 = vcmp.gt.f32.partialorder %v1516_v19, 0.0  ;;  %v1536_v38 = vmul.f32 0.1, %v1516_v19  ;;  %v1517_v49 = vadd.f32 %v2548_v21, %v1500_v41 }
 0x1a6   : > { %v1546_v50 = vsel %vm1526_vm1, %v1516_v19, %v1536_v38  ;;  %vm1527_vm2 = vcmp.gt.f32.partialorder %v1517_v49, 0.0  ;;  %v1537_v52 = vmul.f32 0.1, %v1517_v49 }
 0x1a7   : > { %v1811_v53 = vpack.c.bf16 %v1546_v50, %v1546_v50 }
 0x1a8   : > { %v1547_v54 = vsel %vm1527_vm2, %v1517_v49, %v1537_v52 }
 0x1a9   : > { %1597 = vst.msk [vmem:[%s2556_s20 + $0x20] sm:$0xf] %vm1588_vm9, %v1811_v53  ;;  %v1812_v55 = vpack.c.bf16 %v1547_v54, %v1547_v54 }
 0x1ab   : > { %1598 = vst.msk [vmem:[%s2556_s20 + $0x24] sm:$0xf] %vm1588_vm9, %v1812_v55 }
 0x1ac PF: > { %s13_s14 = sadd.s32 1, %s2149_s14   ;;  %s2605_s12 = smov %s2145_s13 }
 0x1ad   : > { %p10_p5 = scmp.ge.s32.totalorder %s13_s14, 4   ;;  %s2606_s13 = smov %s2608_s15 }
 0x1af   :  { %12 = sbr.rel (!%p10_p5) target bundleno = 2 (0x2), region = 68 }

</bundles_post_ra>
